<compile_context>
chip_gen: v7x
topology: tpu7x:2x2x1
jax: 0.10.0
libtpu: 0.0.40
codegen_flags: <defaults>
</compile_context>

<pallas_src>
import functools
import math

import jax
import jax.numpy as jnp
from jax.experimental import pallas as pl
from jax.experimental.pallas import tpu as pltpu

_SUBLANE = 8
_VMEM_LIMIT_BYTES = 32 * 1024 * 1024   # within physical VMEM on v5e/v6e (128 MiB) and v7x (64 MiB)
_VMEM_BUDGET_BYTES = 24 * 1024 * 1024  # headroom under the explicit limit


def _round_up(x, m):
    return ((x + m - 1) // m) * m


def _lcm(a, b):
    return a * b // math.gcd(a, b)


def _num_tensorcores_per_chip():
    """2 on v7x (megacore grid sharding pays off), else 1 (v5e/v6e are single-TC)."""
    try:
        kind = jax.devices()[0].device_kind.lower()
    except Exception:
        return 1
    return 2 if "v7" in kind else 1


def _vmem_estimate(bm, d_emb, d_inp, nv):
    """Double-buffered per-step VMEM working set (bytes), conservative."""
    return 2 * (
        bm * d_emb * 4        # x block (f32)
        + bm * d_emb * 4      # depth tile (f32; constant block, but budgeted anyway)
        + d_emb * d_inp * 2   # linear weight (bf16)
        + 3 * d_inp * 4       # bias / gamma / beta (f32)
        + d_inp * nv * 2      # vote weight (bf16)
        + nv * 4              # vote bias (f32)
        + bm * nv * 2         # output block (bf16)
    )


def _choose_bm(mp, align, d_emb, d_inp, nv, *, cap=256, num_tc=1):
    """Row-tile choice.

    v5e/v6e (1 TC): single largest tile dividing mp (each extra grid step costs ~0.35us
    and bigger tiles approach the HBM roofline).
    v7x (2 TCs): prefer a step count that is a multiple of 2 with >=128 rows per step so
    megacore sharding has real work per core; otherwise fall back to one step.
    bm is capped (default 256) to avoid f32-epilogue vreg spills and filtered against a
    conservative VMEM budget.
    """
    cap = max(align, min(cap, mp))
    cands = [
        bm for bm in range(align, cap + 1, align)
        if mp % bm == 0 and _vmem_estimate(bm, d_emb, d_inp, nv) <= _VMEM_BUDGET_BYTES
    ]
    if not cands:
        return align
    if num_tc >= 2:
        good = [bm for bm in cands if (mp // bm) % num_tc == 0 and bm >= 128]
        if good:
            return max(good)
    return max(cands)


# ----------------------------------------------------------------------------------
# Fused Pallas kernel: depth-add + Linear + Swish + LayerNorm + Routing-1 votes (+B1)
# ----------------------------------------------------------------------------------
def _detect_votes_kernel(x_ref, dep_ref, w_ref, lnp_ref, w1_ref, b1_ref, o_ref, *, eps):
    # x:   (bm, d_emb)    f32 raw embedding rows
    # dep: (bm, d_emb)    f32 depth embeddings pre-tiled to bm rows (constant block)
    # w:   (d_emb, d_inp) bf16 linear weight
    # lnp: (3, d_inp)     f32 rows = [linear bias, LN gamma, LN beta]
    # w1:  (d_inp, Nv)    bf16 routing-1 vote weights (Nv = n_parts*d_cap, unpadded)
    # b1:  (1, Nv)        f32 routing-1 vote bias
    # o:   (bm, Nv)       bf16 votes V1
    x = (x_ref[...] + dep_ref[...]).astype(jnp.bfloat16)
    h = jnp.dot(x, w_ref[...], preferred_element_type=jnp.float32)
    h = h + lnp_ref[0, :]
    # Swish: x * sigmoid(x)  (f32 VPU/EUP)
    h = h * jax.nn.sigmoid(h)
    # LayerNorm, one-pass stats (biased variance): no (h - mean) temporary before squaring.
    mean = jnp.mean(h, axis=-1, keepdims=True)
    mean_sq = jnp.mean(h * h, axis=-1, keepdims=True)
    var = jnp.maximum(mean_sq - mean * mean, 0.0)
    h = (h - mean) * jax.lax.rsqrt(var + eps)
    h = h * lnp_ref[1, :] + lnp_ref[2, :]
    # Routing-1 votes: mu never leaves VMEM; f32 accumulation, bf16 store.
    v = jnp.dot(h.astype(jnp.bfloat16), w1_ref[...], preferred_element_type=jnp.float32)
    o_ref[...] = (v + b1_ref[...]).astype(o_ref.dtype)


def detect_parts_and_votes(x, depth_emb, w_bf16, lnp, w1_bf16, b1_flat, *, eps=1e-5, bm_cap=256):
    """x: [M, d_emb] f32 raw embedding rows -> V1 votes [M, Nv] bf16 (Nv = n_parts*d_cap)."""
    M, d_emb = x.shape
    d_depth = depth_emb.shape[0]
    d_inp = w_bf16.shape[1]
    Nv = w1_bf16.shape[1]

    # Rows padded to a multiple of lcm(8, d_depth) so every block starts at depth index 0.
    align = _lcm(_SUBLANE, d_depth)
    Mp = _round_up(M, align)
    if Mp != M:
        x = jnp.pad(x, ((0, Mp - M), (0, 0)))

    bm = _choose_bm(Mp, align, d_emb, d_inp, Nv, cap=bm_cap,
                    num_tc=_num_tensorcores_per_chip())
    dep_tile = jnp.tile(depth_emb, (bm // d_depth, 1))  # (bm, d_emb); DMA'd once (constant block)

    cost = pl.CostEstimate(
        flops=int(2 * Mp * d_inp * (d_emb + Nv) + 10 * Mp * d_inp),
        transcendentals=int(Mp * d_inp + Mp),
        bytes_accessed=int(
            Mp * d_emb * 4 + bm * d_emb * 4 + d_emb * d_inp * 2
            + 3 * d_inp * 4 + d_inp * Nv * 2 + Nv * 4 + Mp * Nv * 2
        ),
    )
    # NOTE: constant-index operands (dep/w/lnp/w1/b1) could be single-buffered via
    # pipeline_mode=pl.Buffered(1) to halve resident weight VMEM when feature dims grow;
    # negligible at these sizes so left at the default.
    out = pl.pallas_call(
        functools.partial(_detect_votes_kernel, eps=eps),
        out_shape=jax.ShapeDtypeStruct((Mp, Nv), jnp.bfloat16),
        grid=(Mp // bm,),
        in_specs=[
            pl.BlockSpec((bm, d_emb), lambda i: (i, 0)),
            pl.BlockSpec((bm, d_emb), lambda i: (0, 0)),
            pl.BlockSpec((d_emb, d_inp), lambda i: (0, 0)),
            pl.BlockSpec((3, d_inp), lambda i: (0, 0)),
            pl.BlockSpec((d_inp, Nv), lambda i: (0, 0)),
            pl.BlockSpec((1, Nv), lambda i: (0, 0)),
        ],
        out_specs=pl.BlockSpec((bm, Nv), lambda i: (i, 0)),
        compiler_params=pltpu.CompilerParams(
            dimension_semantics=("parallel",),
            vmem_limit_bytes=_VMEM_LIMIT_BYTES,
        ),
        cost_estimate=cost,
    )(x, dep_tile, w_bf16, lnp, w1_bf16, b1_flat)
    return out[:M]


# ----------------------------------------------------------------------------------
# Heinsen routing iterations (E / D / M steps) — tiny iterative tensor algebra, in jnp.
# TODO(synk): Routing class source not provided; follows Heinsen (2019). The per-iteration
# einsums have contraction dims of 8-64, too small to benefit from an MXU Pallas kernel.
# ----------------------------------------------------------------------------------
def routing_iterations(a_inp, V, beta_use, beta_ign, n_iters=3, eps=1e-5):
    # a_inp: [B, n_inp]   V: [B, n_inp, n_out, d_cov, d_out]   betas: [n_inp, n_out]
    Bsz, n_inp, n_out = V.shape[:3]
    f_a = jax.nn.sigmoid(a_inp)                                  # [B, n_inp]
    a_out = mu_out = sig2 = None
    for it in range(n_iters):
        # E-step
        if it == 0:
            R = jnp.full((Bsz, n_inp, n_out), 1.0 / n_out, dtype=V.dtype)
        else:
            V_less_mu2 = (V - mu_out[:, None]) ** 2
            log_p = (
                -jnp.einsum("bijch,bjch->bij", V_less_mu2, 1.0 / (2.0 * sig2))
                - (0.5 * jnp.log(sig2)).sum(axis=(-2, -1))[:, None, :]
            )
            R = jax.nn.softmax(jax.nn.log_sigmoid(a_out)[:, None, :] + log_p, axis=-1)
        # D-step
        D_use = f_a[..., None] * R                               # [B, n_inp, n_out]
        D_ign = f_a[..., None] - D_use
        # M-step
        a_out = (
            jnp.einsum("bij,ij->bj", D_use, beta_use)
            - jnp.einsum("bij,ij->bj", D_ign, beta_ign)
        )
        over = 1.0 / jnp.maximum(D_use.sum(axis=1), 1e-30)       # [B, n_out]; guard all-padding rows
        mu_out = jnp.einsum("bij,bijch->bjch", D_use, V) * over[..., None, None]
        V_less_mu2 = (V - mu_out[:, None]) ** 2
        sig2 = (
            jnp.einsum("bij,bijch->bjch", D_use, V_less_mu2) * over[..., None, None]
            + eps
        )
    return a_out, mu_out, sig2


# ----------------------------------------------------------------------------------
# One-time parameter packing (layout churn hoisted out of the forward pass)
# ----------------------------------------------------------------------------------
def prepare_params(params):
    W1, B1, bu1, bi1 = params["r1"]                              # W1: [1, n_parts, d_inp, d_cap]
    n_parts, d_inp, d_cap = W1.shape[1], W1.shape[2], W1.shape[3]
    n_votes = n_parts * d_cap
    W1_2d = jnp.transpose(W1[0], (1, 0, 2)).reshape(d_inp, n_votes)   # [d_inp, n_parts*d_cap]
    return dict(
        depth_emb=params["depth_emb"],
        w_lin_bf16=params["w_lin"].astype(jnp.bfloat16),
        lnp=jnp.stack([params["b_lin"], params["ln_g"], params["ln_b"]], axis=0),
        w1_bf16=W1_2d.astype(jnp.bfloat16),
        b1_flat=B1.reshape(1, n_votes),
        bu1=bu1,
        bi1=bi1,
        r2=params["r2"],
    )


# ----------------------------------------------------------------------------------
# SSTClassifier forward (wrap in jax.jit at the call site)
# ----------------------------------------------------------------------------------
def sst_classifier_forward(prep, mask, embs, n_iters=3):
    B, n, d_depth, d_emb = embs.shape
    W2, B2, bu2, bi2 = prep["r2"]                                # W2: [n_parts, n_classes, d_cap, d_cap]
    n_parts, d_cap = W2.shape[0], W2.shape[3]
    n_inp1 = n * d_depth

    # a = logit(mask), broadcast over depth -> [B, n*d_depth]  (same +/-inf semantics as torch)
    a = jnp.log(mask / (1.0 - mask))
    a = jnp.broadcast_to(a[..., None], (B, n, d_depth)).reshape(B, n_inp1)

    # Fused depth-add + detect_parts + Routing-1 votes (Pallas): neither the bf16 activation
    # copy nor the intermediate mu ever touch HBM.
    x = embs.reshape(B * n_inp1, d_emb)
    V1 = detect_parts_and_votes(
        x, prep["depth_emb"], prep["w_lin_bf16"], prep["lnp"], prep["w1_bf16"], prep["b1_flat"]
    )
    V1 = V1.astype(jnp.float32).reshape(B, n_inp1, n_parts, 1, d_cap)

    # ---- Routing 1 ----
    bu1e = jnp.broadcast_to(prep["bu1"], (n_inp1, n_parts))
    bi1e = jnp.broadcast_to(prep["bi1"], (n_inp1, n_parts))
    a, mu, sig2 = routing_iterations(a, V1, bu1e, bi1e, n_iters)

    # ---- Routing 2: per-input vote weights (tiny batched matmul, kept in jnp) ----
    V2 = jnp.einsum("ijdh,bicd->bijch", W2, mu) + B2[None, None]
    a, mu, sig2 = routing_iterations(a, V2, bu2, bi2, n_iters)

    return a, mu, sig2


# ----------------------------------------------------------------------------------
# Deterministic parameter init (matches shapes / init scheme of the PyTorch module)
# ----------------------------------------------------------------------------------
def init_params(key, d_depth, d_emb, d_inp, d_cap, n_parts, n_classes):
    k1, k2, k3 = jax.random.split(key, 3)
    return dict(
        depth_emb=jnp.zeros((d_depth, d_emb), jnp.float32),
        # kaiming_normal_ (fan_in = d_emb): std = sqrt(2 / fan_in)
        w_lin=jax.random.normal(k1, (d_emb, d_inp), jnp.float32) * jnp.sqrt(2.0 / d_emb),
        b_lin=jnp.zeros((d_inp,), jnp.float32),
        ln_g=jnp.ones((d_inp,), jnp.float32),
        ln_b=jnp.zeros((d_inp,), jnp.float32),
        # Routing 1: W ~ N(0,1)/d_inp, B/betas = 0
        r1=(
            jax.random.normal(k2, (1, n_parts, d_inp, d_cap), jnp.float32) / d_inp,
            jnp.zeros((n_parts, 1, d_cap), jnp.float32),
            jnp.zeros((1, n_parts), jnp.float32),
            jnp.zeros((1, n_parts), jnp.float32),
        ),
        # Routing 2: W ~ N(0,1)/d_cap, B/betas = 0
        r2=(
            jax.random.normal(k3, (n_parts, n_classes, d_cap, d_cap), jnp.float32) / d_cap,
            jnp.zeros((n_classes, 1, d_cap), jnp.float32),
            jnp.zeros((n_parts, n_classes), jnp.float32),
            jnp.zeros((n_parts, n_classes), jnp.float32),
        ),
    )


if __name__ == "__main__":
    B, n, d_depth, d_emb = 2, 8, 2, 32
    d_inp, d_cap, n_parts, n_classes, n_iters = 32, 8, 8, 4, 3

    key = jax.random.PRNGKey(0)
    kp, ke = jax.random.split(key)
    params = init_params(kp, d_depth, d_emb, d_inp, d_cap, n_parts, n_classes)
    prep = prepare_params(params)  # one-time packing / bf16 cast / layout

    embs = jax.random.normal(ke, (B, n, d_depth, d_emb), jnp.float32)
    # 1.0 for real tokens, 0.0 for padding (last two positions padded)
    mask = jnp.concatenate(
        [jnp.ones((B, n - 2), jnp.float32), jnp.zeros((B, 2), jnp.float32)], axis=1
    )

    # Whole forward under one jit: Pallas kernel + routing algebra compiled/fused together.
    fwd = jax.jit(functools.partial(sst_classifier_forward, n_iters=n_iters))
    a_out, mu_out, sig2_out = fwd(prep, mask, embs)
    jax.block_until_ready((a_out, mu_out, sig2_out))

    assert a_out.shape == (B, n_classes)
    assert mu_out.shape == (B, n_classes, 1, d_cap)
    assert sig2_out.shape == (B, n_classes, 1, d_cap)
    assert bool(jnp.all(jnp.isfinite(a_out)))
    assert bool(jnp.all(jnp.isfinite(mu_out)))
    assert bool(jnp.all(jnp.isfinite(sig2_out)))
    print("KERNEL_OK")
</pallas_src>

<mosaic_0001>
module attributes {stable_mosaic.version = 11 : i64} {
  func.func @_detect_votes_kernel(%arg0: i32, %arg1: memref<32x32xf32, #tpu.memory_space<vmem>>, %arg2: memref<32x32xf32, #tpu.memory_space<vmem>>, %arg3: memref<32x32xbf16, #tpu.memory_space<vmem>>, %arg4: memref<3x32xf32, #tpu.memory_space<vmem>>, %arg5: memref<32x64xbf16, #tpu.memory_space<vmem>>, %arg6: memref<1x64xf32, #tpu.memory_space<vmem>>, %arg7: memref<32x64xbf16, #tpu.memory_space<vmem>>) attributes {dimension_semantics = [#tpu.dimension_semantics<parallel>], iteration_bounds = array<i64: 1>, scalar_prefetch = 0 : i64, scratch_operands = 0 : i64, tpu.core_type = #tpu.core_type<tc>, window_params = [{transform_indices = @transform_0, window_bounds = array<i64: 32, 32>}, {pipeline_mode = #tpu.pipeline_mode<synchronous>, transform_indices = @transform_1, window_bounds = array<i64: 32, 32>}, {pipeline_mode = #tpu.pipeline_mode<synchronous>, transform_indices = @transform_2, window_bounds = array<i64: 32, 32>}, {pipeline_mode = #tpu.pipeline_mode<synchronous>, transform_indices = @transform_3, window_bounds = array<i64: 3, 32>}, {pipeline_mode = #tpu.pipeline_mode<synchronous>, transform_indices = @transform_4, window_bounds = array<i64: 32, 64>}, {pipeline_mode = #tpu.pipeline_mode<synchronous>, transform_indices = @transform_5, window_bounds = array<i64: 1, 64>}, {transform_indices = @transform_6, window_bounds = array<i64: 32, 64>}]} {
    %c0 = arith.constant 0 : index
    %c0_0 = arith.constant 0 : index
    %0 = vector.load %arg1[%c0, %c0_0] : memref<32x32xf32, #tpu.memory_space<vmem>>, vector<32x32xf32>
    %c0_1 = arith.constant 0 : index
    %c0_2 = arith.constant 0 : index
    %1 = vector.load %arg2[%c0_1, %c0_2] : memref<32x32xf32, #tpu.memory_space<vmem>>, vector<32x32xf32>
    %2 = arith.addf %0, %1 : vector<32x32xf32>
    %3 = arith.truncf %2 : vector<32x32xf32> to vector<32x32xbf16>
    %c0_3 = arith.constant 0 : index
    %c0_4 = arith.constant 0 : index
    %4 = vector.load %arg3[%c0_3, %c0_4] : memref<32x32xbf16, #tpu.memory_space<vmem>>, vector<32x32xbf16>
    %cst = arith.constant dense<0.000000e+00> : vector<32x32xf32>
    %5 = tpu.matmul %3, %4, %cst {dimension_numbers = #tpu.dot_dimension_numbers<[1], [0], [0], [1], [0, 0, 1, 1], [], []>} : vector<32x32xbf16>, vector<32x32xbf16>, vector<32x32xf32> -> vector<32x32xf32>
    %c0_5 = arith.constant 0 : index
    %c0_6 = arith.constant 0 : index
    %6 = vector.load %arg4[%c0_5, %c0_6] : memref<3x32xf32, #tpu.memory_space<vmem>>, vector<1x32xf32>
    %7 = vector.shape_cast %6 : vector<1x32xf32> to vector<32xf32>
    %8 = vector.shape_cast %7 : vector<32xf32> to vector<1x32xf32>
    %9 = vector.broadcast %8 : vector<1x32xf32> to vector<32x32xf32>
    %10 = arith.addf %5, %9 : vector<32x32xf32>
    %11 = arith.negf %10 : vector<32x32xf32>
    %12 = math.exp %11 : vector<32x32xf32>
    %cst_7 = arith.constant 1.000000e+00 : f32
    %13 = vector.broadcast %cst_7 : f32 to vector<32x32xf32>
    %14 = arith.addf %13, %12 : vector<32x32xf32>
    %15 = arith.divf %13, %14 : vector<32x32xf32>
    %16 = arith.mulf %10, %15 : vector<32x32xf32>
    %cst_8 = arith.constant dense<0.000000e+00> : vector<32xf32>
    %17 = vector.multi_reduction <add>, %16, %cst_8 [1] : vector<32x32xf32> to vector<32xf32>
    %18 = vector.shape_cast %17 : vector<32xf32> to vector<32x1xf32>
    %cst_9 = arith.constant 3.200000e+01 : f32
    %19 = vector.broadcast %cst_9 : f32 to vector<32x1xf32>
    %20 = arith.divf %18, %19 : vector<32x1xf32>
    %21 = arith.mulf %16, %16 : vector<32x32xf32>
    %cst_10 = arith.constant dense<0.000000e+00> : vector<32xf32>
    %22 = vector.multi_reduction <add>, %21, %cst_10 [1] : vector<32x32xf32> to vector<32xf32>
    %23 = vector.shape_cast %22 : vector<32xf32> to vector<32x1xf32>
    %cst_11 = arith.constant 3.200000e+01 : f32
    %24 = vector.broadcast %cst_11 : f32 to vector<32x1xf32>
    %25 = arith.divf %23, %24 : vector<32x1xf32>
    %26 = arith.mulf %20, %20 : vector<32x1xf32>
    %27 = arith.subf %25, %26 : vector<32x1xf32>
    %cst_12 = arith.constant 0.000000e+00 : f32
    %28 = vector.broadcast %cst_12 : f32 to vector<32x1xf32>
    %29 = arith.maximumf %27, %28 : vector<32x1xf32>
    %30 = vector.broadcast %20 : vector<32x1xf32> to vector<32x32xf32>
    %31 = arith.subf %16, %30 : vector<32x32xf32>
    %cst_13 = arith.constant 9.99999974E-6 : f32
    %32 = vector.broadcast %cst_13 : f32 to vector<32x1xf32>
    %33 = arith.addf %29, %32 : vector<32x1xf32>
    %34 = math.rsqrt %33 : vector<32x1xf32>
    %35 = vector.broadcast %34 : vector<32x1xf32> to vector<32x32xf32>
    %36 = arith.mulf %31, %35 : vector<32x32xf32>
    %c1 = arith.constant 1 : index
    %c0_14 = arith.constant 0 : index
    %37 = vector.load %arg4[%c1, %c0_14] : memref<3x32xf32, #tpu.memory_space<vmem>>, vector<1x32xf32>
    %38 = vector.shape_cast %37 : vector<1x32xf32> to vector<32xf32>
    %39 = vector.shape_cast %38 : vector<32xf32> to vector<1x32xf32>
    %40 = vector.broadcast %39 : vector<1x32xf32> to vector<32x32xf32>
    %41 = arith.mulf %36, %40 : vector<32x32xf32>
    %c2 = arith.constant 2 : index
    %c0_15 = arith.constant 0 : index
    %42 = vector.load %arg4[%c2, %c0_15] : memref<3x32xf32, #tpu.memory_space<vmem>>, vector<1x32xf32>
    %43 = vector.shape_cast %42 : vector<1x32xf32> to vector<32xf32>
    %44 = vector.shape_cast %43 : vector<32xf32> to vector<1x32xf32>
    %45 = vector.broadcast %44 : vector<1x32xf32> to vector<32x32xf32>
    %46 = arith.addf %41, %45 : vector<32x32xf32>
    %47 = arith.truncf %46 : vector<32x32xf32> to vector<32x32xbf16>
    %c0_16 = arith.constant 0 : index
    %c0_17 = arith.constant 0 : index
    %48 = vector.load %arg5[%c0_16, %c0_17] : memref<32x64xbf16, #tpu.memory_space<vmem>>, vector<32x64xbf16>
    %cst_18 = arith.constant dense<0.000000e+00> : vector<32x64xf32>
    %49 = tpu.matmul %47, %48, %cst_18 {dimension_numbers = #tpu.dot_dimension_numbers<[1], [0], [0], [1], [0, 0, 1, 1], [], []>} : vector<32x32xbf16>, vector<32x64xbf16>, vector<32x64xf32> -> vector<32x64xf32>
    %c0_19 = arith.constant 0 : index
    %c0_20 = arith.constant 0 : index
    %50 = vector.load %arg6[%c0_19, %c0_20] : memref<1x64xf32, #tpu.memory_space<vmem>>, vector<1x64xf32>
    %51 = vector.broadcast %50 : vector<1x64xf32> to vector<32x64xf32>
    %52 = arith.addf %49, %51 : vector<32x64xf32>
    %53 = arith.truncf %52 : vector<32x64xf32> to vector<32x64xbf16>
    %c0_21 = arith.constant 0 : index
    %c0_22 = arith.constant 0 : index
    %54 = vector.load %arg7[%c0_21, %c0_22] : memref<32x64xbf16, #tpu.memory_space<vmem>>, vector<32x64xbf16>
    tpu.vector_store %arg7[%c0_21, %c0_22], %53 {strides = array<i32>} : memref<32x64xbf16, #tpu.memory_space<vmem>>, vector<32x64xbf16>,
    return
  }
  func.func @transform_0(%arg0: i32) -> (i32, i32) {
    %c0_i32 = arith.constant 0 : i32
    %c0_i32_0 = arith.constant 0 : i32
    return %arg0, %c0_i32 : i32, i32
  }
  func.func @transform_1(%arg0: i32) -> (i32, i32) {
    %c0_i32 = arith.constant 0 : i32
    %c0_i32_0 = arith.constant 0 : i32
    %c0_i32_1 = arith.constant 0 : i32
    return %c0_i32, %c0_i32_0 : i32, i32
  }
  func.func @transform_2(%arg0: i32) -> (i32, i32) {
    %c0_i32 = arith.constant 0 : i32
    %c0_i32_0 = arith.constant 0 : i32
    %c0_i32_1 = arith.constant 0 : i32
    return %c0_i32, %c0_i32_0 : i32, i32
  }
  func.func @transform_3(%arg0: i32) -> (i32, i32) {
    %c0_i32 = arith.constant 0 : i32
    %c0_i32_0 = arith.constant 0 : i32
    %c0_i32_1 = arith.constant 0 : i32
    return %c0_i32, %c0_i32_0 : i32, i32
  }
  func.func @transform_4(%arg0: i32) -> (i32, i32) {
    %c0_i32 = arith.constant 0 : i32
    %c0_i32_0 = arith.constant 0 : i32
    %c0_i32_1 = arith.constant 0 : i32
    return %c0_i32, %c0_i32_0 : i32, i32
  }
  func.func @transform_5(%arg0: i32) -> (i32, i32) {
    %c0_i32 = arith.constant 0 : i32
    %c0_i32_0 = arith.constant 0 : i32
    %c0_i32_1 = arith.constant 0 : i32
    return %c0_i32, %c0_i32_0 : i32, i32
  }
  func.func @transform_6(%arg0: i32) -> (i32, i32) {
    %c0_i32 = arith.constant 0 : i32
    %c0_i32_0 = arith.constant 0 : i32
    return %arg0, %c0_i32 : i32, i32
  }
}

</mosaic_0001>

<bundles_post_ra>
// kernel: sst_classifier_forward.1
= control target key start
LH: loop header
LB: loop body
LE: loop exit
PB: predicated region body
PF: predicated region fallthrough
CT: control target
= control target key end

     0   :  { %vm59_vm0 = vcmask 261120   ;;  %vm322_vm1 = vcmask 519168   ;;  %s538_s2 = inlined_call_operand.vmem [shape: bf16[32,32], index: 2, kind: input, shape index: {}]   ;;  %s539_s0 = inlined_call_operand.vmem [shape: f32[32,32], index: 0, kind: input, shape index: {}]   ;;  %s540_s1 = inlined_call_operand.vmem [shape: f32[32,32], index: 1, kind: input, shape index: {}]   ;;  %s541_s3 = inlined_call_operand.vmem [shape: f32[3,32], index: 3, kind: input, shape index: {}]   ;;  %s542_s4 = inlined_call_operand.vmem [shape: bf16[32,64], index: 4, kind: input, shape index: {}]   ;;  %s543_s5 = inlined_call_operand.vmem [shape: f32[1,64], index: 5, kind: input, shape index: {}]   ;;  %s544_s6 = inlined_call_operand.vmem [shape: bf16[32,64], index: 6, kind: output, shape index: {}]  }
   0x1   :  { %v379_v0 = vld [vmem:[%s538_s2] sm:$0xff]   ;;  %v380_v1 = vld [vmem:[%s538_s2 + $0x8] sm:$0xff]   ;;  %v26_v7 = vld [vmem:[%s539_s0 + $0x10] sm:$0xff] }
   0x2   :  { %363 = vmatprep.subr.bf16.mxu0 %v379_v0  ;;  %v24_v2 = vld [vmem:[%s539_s0] sm:$0xff]  ;;  %v25_v3 = vld [vmem:[%s539_s0 + $0x8] sm:$0xff]  ;;  %v27_v8 = vld [vmem:[%s539_s0 + $0x18] sm:$0xff] }
   0x3   :  { %v28_v4 = vld [vmem:[%s540_s1] sm:$0xff]  ;;  %364 = vmatpush3.bf16.msra.mxu0 %v379_v0  ;;  %v29_v5 = vld [vmem:[%s540_s1 + $0x8] sm:$0xff]  ;;  %v30_v10 = vld [vmem:[%s540_s1 + $0x10] sm:$0xff] }
   0x4   :  { %v32_v6 = vadd.f32 %v28_v4, %v24_v2  ;;  %365 = vmatprep.subr.bf16.mxu0 %v380_v1  ;;  %v33_v9 = vadd.f32 %v29_v5, %v25_v3  ;;  %v31_v11 = vld [vmem:[%s540_s1 + $0x18] sm:$0xff]  ;;  %v34_v12 = vadd.f32 %v30_v10, %v26_v7  ;;  %v331_v16 = vld [vmem:[%s541_s3] ss:$0 sm:$0xff]  ;;  %v382_v58 = vld [vmem:[%s542_s4 + $0x8] sm:$0xff]  }
   0x5   :  { %v35_v13 = vadd.f32 %v31_v11, %v27_v8  ;;  %v381_v57 = vld [vmem:[%s542_s4] sm:$0xff]  }
   0x6   :  { %v36_v14 = vpack.c.bf16 %v33_v9, %v32_v6  ;;  %371 = vmatprep.subr.bf16.mxu1 %v381_v57 }
   0x7   :  { %366 = vmatpush3.bf16.msra.mxu0 %v380_v1  ;;  %v37_v15 = vpack.c.bf16 %v35_v13, %v34_v12  ;;  %372 = vmatpush3.bf16.msra.mxu1 %v381_v57 }
   0x8   :  { %367 = vmatprep.mubr.msk.bf16.mxu0 %vm59_vm0, %v36_v14  ;;  %373 = vmatprep.subr.bf16.mxu1 %v382_v58 }
   0xa   :  { %368 = vmatmul.mubr.msk.bf16.vlgmr.msra.gmra.mrb[0].mxu0 %vm59_vm0, %v37_v15 }
   0xb   :  { %374 = vmatpush3.bf16.msra.mxu1 %v382_v58 }
  0xdd   :  { %v369_v17 = vpop.f32.mrb[0].mxu0 }
  0xde   :  { %v109_v18 = vadd.f32 %v369_v17, %v331_v16  ;;  %v100_v19 = vpop.f32.mrb[1].mxu0 }
  0xdf   :  { %v101_v20 = vadd.f32 %v331_v16, %v100_v19  ;;  %v370_v21 = vpop.f32.mrb[2].mxu0 }
  0xe0   :  { %v338_v22 = vmul.f32 -1.442695, %v109_v18  ;;  %v112_v23 = vadd.f32 %v370_v21, %v331_v16  ;;  %v103_v24 = vpop.f32.mrb[3].mxu0 }
  0xe1   :  { %v336_v25 = vmul.f32 -1.442695, %v101_v20  ;;  %v104_v26 = vadd.f32 %v331_v16, %v103_v24 }
  0xe2   :  { %383 = vpow2.f32 %v338_v22  ;;  %v339_v27 = vmul.f32 -1.442695, %v112_v23 }
  0xe3   :  { %385 = vpow2.f32 %v336_v25  ;;  %v337_v28 = vmul.f32 -1.442695, %v104_v26 }
  0xe4   :  { %387 = vpow2.f32 %v339_v27 }
  0xe5   :  { %389 = vpow2.f32 %v337_v28 }
  0xec   :  { %v384_v29 = vpop.eup %383 }
  0xed   :  { %v386_v30 = vpop.eup %385  ;;  %v129_v31 = vadd.f32 1.0, %v384_v29  ;;  %v340_v29 = vld [vmem:[%s541_s3 + $0x1] ss:$0 sm:$0xff] }
  0xee   :  { %v388_v32 = vpop.eup %387  ;;  %v127_v33 = vadd.f32 1.0, %v386_v30 }
  0xef   :  { %v390_v34 = vpop.eup %389  ;;  %391 = vrcp.f32 %v129_v31  ;;  %v130_v35 = vadd.f32 1.0, %v388_v32 }
  0xf0   :  { %393 = vrcp.f32 %v127_v33  ;;  %v128_v36 = vadd.f32 1.0, %v390_v34  ;;  %v341_v34 = vld [vmem:[%s541_s3 + $0x2] ss:$0 sm:$0xff] }
  0xf1   :  { %395 = vrcp.f32 %v130_v35 }
  0xf2   :  { %397 = vrcp.f32 %v128_v36 }
  0xf9   :  { %v392_v37 = vpop.eup %391 }
  0xfa   :  { %v394_v38 = vpop.eup %393  ;;  %v477_v39 = vmul.f32 %v392_v37, %v109_v18 }
  0xfb   :  { %v396_v40 = vpop.eup %395  ;;  %v479_v41 = vmul.f32 %v394_v38, %v101_v20 }
  0xfc   :  { %v398_v42 = vpop.eup %397  ;;  %v481_v43 = vmul.f32 %v396_v40, %v112_v23  ;;  %v149_v44 = vsel %vm59_vm0, %v477_v39, 0.0  ;;  %v162_v54 = vmul.f32 %v477_v39, %v477_v39 }
  0xfd   :  { %v485_v45 = vmul.f32 %v398_v42, %v104_v26  ;;  %150 = vadd.xlane.f32.xlu1 %v149_v44  ;;  %v143_v46 = vsel %vm59_vm0, %v479_v41, 0.0  ;;  %v160_v50 = vmul.f32 %v479_v41, %v479_v41 }
  0xfe   :  { %144 = vadd.xlane.f32.xlu0 %v143_v46  ;;  %v152_v47 = vsel %vm59_vm0, %v481_v43, 0.0  ;;  %v163_v52 = vmul.f32 %v481_v43, %v481_v43  ;;  %v170_v56 = vsel %vm59_vm0, %v162_v54, 0.0 }
  0xff   :  { %v161_v48 = vmul.f32 %v485_v45, %v485_v45  ;;  %v146_v49 = vsel %vm59_vm0, %v485_v45, 0.0  ;;  %v164_v53 = vsel %vm59_vm0, %v160_v50, 0.0 }
 0x100   :  { %v173_v55 = vsel %vm59_vm0, %v163_v52, 0.0 }
 0x101   :  { %153 = vadd.xlane.f32.xlu1 %v152_v47  ;;  %v167_v51 = vsel %vm59_vm0, %v161_v48, 0.0 }
 0x102   :  { %147 = vadd.xlane.f32.xlu0 %v146_v49 }
 0x105   :  { %168 = vadd.xlane.f32.xlu1 %v167_v51 }
 0x106   :  { %165 = vadd.xlane.f32.xlu0 %v164_v53 }
 0x109   :  { %174 = vadd.xlane.f32.xlu1 %v173_v55 }
 0x10a   :  { %171 = vadd.xlane.f32.xlu0 %v170_v56 }
 0x18a   :  { %v151_v59 = vpop.xlane.xlu1 %150 }
 0x18b   :  { %v145_v60 = vpop.xlane.xlu0 %144  ;;  %v158_v6 = vmul.f32 0.03125, %v151_v59 }
 0x18c   :  { %v156_v63 = vmul.f32 0.03125, %v145_v60 }
 0x18d   :  { %v182_v16 = vmul.f32 %v158_v6, %v158_v6  ;;  %v194_v38 = vsub.f32 %v477_v39, %v158_v6  ;;  %v342_v39 = vld [vmem:[%s543_s5] ss:$0 sm:$0xff] }
 0x18e   :  { %v154_v61 = vpop.xlane.xlu1 %153  ;;  %v180_v7 = vmul.f32 %v156_v63, %v156_v63  ;;  %v192_v30 = vsub.f32 %v479_v41, %v156_v63 }
 0x18f   :  { %v148_v62 = vpop.xlane.xlu0 %147  ;;  %v159_v3 = vmul.f32 0.03125, %v154_v61 }
 0x190   :  { %v157_v0 = vmul.f32 0.03125, %v148_v62 }
 0x191   :  { %v183_v12 = vmul.f32 %v159_v3, %v159_v3  ;;  %v195_v35 = vsub.f32 %v481_v43, %v159_v3 }
 0x192   :  { %v181_v1 = vmul.f32 %v157_v0, %v157_v0  ;;  %v169_v2 = vpop.xlane.xlu1 %168  ;;  %v193_v27 = vsub.f32 %v485_v45, %v157_v0 }
 0x193   :  { %v177_v4 = vmul.f32 0.03125, %v169_v2  ;;  %v166_v5 = vpop.xlane.xlu0 %165 }
 0x194   :  { %v176_v8 = vmul.f32 0.03125, %v166_v5 }
 0x195   :  { %v185_v9 = vsub.f32 %v177_v4, %v181_v1 }
 0x196   :  { %v184_v10 = vsub.f32 %v176_v8, %v180_v7  ;;  %v175_v11 = vpop.xlane.xlu1 %174 }
 0x197   :  { %v189_v13 = vmax.f32 %v185_v9, 0.0  ;;  %v179_v14 = vmul.f32 0.03125, %v175_v11  ;;  %v172_v15 = vpop.xlane.xlu0 %171 }
 0x198   :  { %v188_v17 = vmax.f32 %v184_v10, 0.0  ;;  %v178_v18 = vmul.f32 0.03125, %v172_v15 }
 0x199   :  { %v197_v19 = vadd.f32 1e-05, %v189_v13  ;;  %v187_v20 = vsub.f32 %v179_v14, %v183_v12 }
 0x19a   :  { %v196_v21 = vadd.f32 1e-05, %v188_v17  ;;  %v186_v22 = vsub.f32 %v178_v18, %v182_v16 }
 0x19b   :  { %399 = vrsqrt.f32 %v197_v19  ;;  %v191_v23 = vmax.f32 %v187_v20, 0.0 }
 0x19c   :  { %401 = vrsqrt.f32 %v196_v21  ;;  %v190_v24 = vmax.f32 %v186_v22, 0.0 }
 0x19d   :  { %v199_v25 = vadd.f32 1e-05, %v191_v23 }
 0x19e   :  { %v198_v26 = vadd.f32 1e-05, %v190_v24 }
 0x19f   :  { %403 = vrsqrt.f32 %v199_v25 }
 0x1a0   :  { %405 = vrsqrt.f32 %v198_v26 }
 0x1a5   :  { %v400_v28 = vpop.eup %399 }
 0x1a6   :  { %v402_v31 = vpop.eup %401  ;;  %v205_v32 = vmul.f32 %v400_v28, %v193_v27 }
 0x1a7   :  { %v204_v33 = vmul.f32 %v402_v31, %v192_v30 }
 0x1a8   :  { %v214_v36 = vmul.f32 %v340_v29, %v205_v32 }
 0x1a9   :  { %v404_v37 = vpop.eup %403  ;;  %v213_v40 = vmul.f32 %v340_v29, %v204_v33 }
 0x1aa   :  { %v406_v42 = vpop.eup %405  ;;  %v223_v44 = vadd.f32 %v341_v34, %v214_v36  ;;  %v207_v45 = vmul.f32 %v404_v37, %v195_v35 }
 0x1ab   :  { %v222_v46 = vadd.f32 %v341_v34, %v213_v40  ;;  %v206_v47 = vmul.f32 %v406_v42, %v194_v38 }
 0x1ac   :  { %v216_v41 = vmul.f32 %v340_v29, %v207_v45 }
 0x1ad   :  { %v226_v48 = vpack.c.bf16 %v223_v44, %v222_v46  ;;  %v215_v49 = vmul.f32 %v340_v29, %v206_v47 }
 0x1ae   :  { %v225_v50 = vadd.f32 %v341_v34, %v216_v41 }
 0x1af   :  { %375 = vmatprep.mubr.msk.bf16.mxu1 %vm59_vm0, %v226_v48  ;;  %v224_v51 = vadd.f32 %v341_v34, %v215_v49 }
 0x1b1   :  { %v227_v52 = vpack.c.bf16 %v225_v50, %v224_v51 }
 0x1b3   :  { %376 = vmatmul.mubr.msk.bf16.vlgmr.msra.gmra.mrb[0].mxu1 %vm59_vm0, %v227_v52 }
 0x286   :  { %v377_v43 = vpop.f32.mrb[0].mxu1 }
 0x287   :  { %v300_v53 = vadd.f32 %v377_v43, %v342_v39  ;;  %v291_v54 = vpop.f32.mrb[1].mxu1 }
 0x288   :  { %v292_v55 = vadd.f32 %v342_v39, %v291_v54  ;;  %v378_v56 = vpop.f32.mrb[2].mxu1 }
 0x289   :  { %v353_v57 = vpack.c.bf16 %v300_v53, %v300_v53  ;;  %v303_v58 = vadd.f32 %v378_v56, %v342_v39  ;;  %v294_v59 = vpop.f32.mrb[3].mxu1 }
 0x28a   :  { %v351_v60 = vpack.c.bf16 %v292_v55, %v292_v55  ;;  %v295_v61 = vadd.f32 %v342_v39, %v294_v59 }
 0x28b   :  { %325 = vst.msk [vmem:[%s544_s6 + $0x8] sm:$0xf] %vm322_vm1, %v353_v57  ;;  %v354_v62 = vpack.c.bf16 %v303_v58, %v303_v58 }
 0x28c   :  { %323 = vst.msk [vmem:[%s544_s6] sm:$0xf] %vm322_vm1, %v351_v60  ;;  %v352_v63 = vpack.c.bf16 %v295_v61, %v295_v61 }
 0x28d   :  { %326 = vst.msk [vmem:[%s544_s6 + $0xc] sm:$0xf] %vm322_vm1, %v354_v62 }
 0x28e   :  { %324 = vst.msk [vmem:[%s544_s6 + $0x4] sm:$0xf] %vm322_vm1, %v352_v63 }

</bundles_post_ra>
